<compile_context>
chip_gen: v5e
topology: v5e:2x2
jax: 0.10.0
libtpu: 0.0.40
codegen_flags: <defaults>
</compile_context>

<pallas_src>
import functools

import numpy as np
import jax
import jax.numpy as jnp
from jax.experimental import pallas as pl
from jax.experimental.pallas import tpu as pltpu


# ----------------------------------------------------------------------------
# Fused Pallas kernel: the whole VAE forward for one (padded) batch.
# ----------------------------------------------------------------------------
def _vae_fused_kernel(x_ref, eps_ref, w_ref, b_ref, out_ref, *,
                      latent_dim: int, row_offs):
    f32, bf16 = jnp.float32, jnp.bfloat16
    L = latent_dim
    o1, o2, oml, odc, o3, oend = row_offs   # static row offsets in the W slab

    x = x_ref[...].astype(bf16)                                    # [B, depth*16]

    # encoder: Conv2d(depth,16,k=3,s=1,p=1) + ReLU   (lowered to one matmul)
    h = jnp.dot(x, w_ref[o1:o2, :256], preferred_element_type=f32) + b_ref[0:1, :256]
    h = jnp.maximum(h, 0.0).astype(bf16)                           # [B, 256]

    # encoder: Conv2d(16,32,k=2,s=2) + ReLU + Flatten (NCHW order preserved)
    h = jnp.dot(h, w_ref[o2:oml, :128], preferred_element_type=f32) + b_ref[1:2, :128]
    h = jnp.maximum(h, 0.0).astype(bf16)                           # [B, 128]

    # fc_mu | fc_logvar fused into a single dot -> [B, 2L] (f32)
    ml = (jnp.dot(h, w_ref[oml:odc, :2 * L], preferred_element_type=f32)
          + b_ref[2:3, :2 * L])
    mu = ml[:, :L]
    logvar = ml[:, L:]

    # reparameterize: z = eps * exp(0.5*logvar) + mu  (in-register, EUP exp, f32)
    z = (eps_ref[...] * jnp.exp(logvar * 0.5) + mu).astype(bf16)   # [B, L]

    # decoder_fc ∘ ConvTranspose2d(32,16,k=2,s=2) (composed at prepare time) + ReLU
    h = jnp.dot(z, w_ref[odc:odc + L, :256], preferred_element_type=f32) + b_ref[3:4, :256]
    h = jnp.maximum(h, 0.0).astype(bf16)                           # [B, 256]

    # decoder: Conv2d(16,1,k=3,p=1)  (lowered) -> [B, 16]
    recon = jnp.dot(h, w_ref[o3:oend, :16], preferred_element_type=f32) + b_ref[4:5, :16]

    # single lane-packed output: [recon(16) | mu(L) | logvar(L)]
    out_ref[...] = jnp.concatenate([recon, ml], axis=1)            # [B, 16+2L]


def vae_forward(packed, x_nchw, eps, *, latent_dim, row_offs):
    """x_nchw: [B, depth, 4, 4] -> (x_recon [B,1,4,4], (mu, logvar))."""
    B, depth, H, W = x_nchw.shape
    assert (H, W) == (4, 4), "module architecture implies 4x4 spatial input"
    L = latent_dim

    x_flat = x_nchw.reshape(B, -1)                 # contiguous NCHW flatten (free)
    B_pad = max(8, ((B + 7) // 8) * 8)             # pad batch to the f32 sublane tile
    if B_pad != B:
        x_flat = jnp.pad(x_flat, ((0, B_pad - B), (0, 0)))
        eps = jnp.pad(eps, ((0, B_pad - B), (0, 0)))

    out = pl.pallas_call(
        functools.partial(_vae_fused_kernel, latent_dim=L, row_offs=row_offs),
        out_shape=jax.ShapeDtypeStruct((B_pad, 16 + 2 * L), jnp.float32),
        in_specs=[pl.BlockSpec(memory_space=pltpu.MemorySpace.VMEM)] * 4,
        out_specs=pl.BlockSpec(memory_space=pltpu.MemorySpace.VMEM),
    )(x_flat, eps, packed["w"], packed["b"])

    x_recon = out[:B, :16].reshape(B, 1, 4, 4)     # contiguous reshape (free)
    mu = out[:B, 16:16 + L]
    logvar = out[:B, 16 + L:16 + 2 * L]
    return x_recon, (mu, logvar)


# ----------------------------------------------------------------------------
# Parameters in native PyTorch layouts + one-time lowering / packing.
# ----------------------------------------------------------------------------
def init_params(key, depth, latent_dim):
    """PyTorch-shaped params: Conv2d [OC,IC,KH,KW], ConvTranspose2d [IC,OC,KH,KW],
    Linear [out, in]."""
    def rnd(k, shape, scale=0.1):
        return scale * jax.random.normal(k, shape, dtype=jnp.float32)
    ks = jax.random.split(key, 14)
    return {
        "conv1_w": rnd(ks[0], (16, depth, 3, 3)),  "conv1_b": rnd(ks[1], (16,)),
        "conv2_w": rnd(ks[2], (32, 16, 2, 2)),     "conv2_b": rnd(ks[3], (32,)),
        "fc_mu_w": rnd(ks[4], (latent_dim, 128)),  "fc_mu_b": rnd(ks[5], (latent_dim,)),
        "fc_lv_w": rnd(ks[6], (latent_dim, 128)),  "fc_lv_b": rnd(ks[7], (latent_dim,)),
        "dec_fc_w": rnd(ks[8], (128, latent_dim)), "dec_fc_b": rnd(ks[9], (128,)),
        "convt_w": rnd(ks[10], (32, 16, 2, 2)),    "convt_b": rnd(ks[11], (16,)),
        "conv3_w": rnd(ks[12], (1, 16, 3, 3)),     "conv3_b": rnd(ks[13], (1,)),
    }


def _lower_conv2d(w, b, in_chw, stride, pad):
    """Conv2d(w [OC,IC,KH,KW], b [OC]) on (IC,H,W) -> (M, bias) so that
    NCHW-flatten(out) = NCHW-flatten(in) @ M + bias.  Exact (conv is linear)."""
    w = np.asarray(w, np.float32)
    b = np.asarray(b, np.float32)
    OC, IC, KH, KW = w.shape
    C, H, W = in_chw
    assert C == IC
    OH = (H + 2 * pad - KH) // stride + 1
    OW = (W + 2 * pad - KW) // stride + 1
    M = np.zeros((IC * H * W, OC * OH * OW), np.float32)
    for oc in range(OC):
        for oy in range(OH):
            for ox in range(OW):
                q = (oc * OH + oy) * OW + ox
                for ic in range(IC):
                    for ky in range(KH):
                        iy = oy * stride + ky - pad
                        if not (0 <= iy < H):
                            continue
                        for kx in range(KW):
                            ix = ox * stride + kx - pad
                            if 0 <= ix < W:
                                M[(ic * H + iy) * W + ix, q] += w[oc, ic, ky, kx]
    bias = np.repeat(b, OH * OW)
    return M, bias


def _lower_conv_transpose2d(w, b, in_chw, stride):
    """ConvTranspose2d with kernel_size == stride. w: [IC,OC,KH,KW], b: [OC]."""
    w = np.asarray(w, np.float32)
    b = np.asarray(b, np.float32)
    IC, OC, KH, KW = w.shape
    C, H, W = in_chw
    assert C == IC and KH == stride and KW == stride
    OH, OW = H * stride, W * stride
    M = np.zeros((IC * H * W, OC * OH * OW), np.float32)
    for ic in range(IC):
        for i in range(H):
            for j in range(W):
                r = (ic * H + i) * W + j
                for oc in range(OC):
                    for ki in range(KH):
                        for kj in range(KW):
                            q = (oc * OH + (i * stride + ki)) * OW + (j * stride + kj)
                            M[r, q] += w[ic, oc, ki, kj]
    bias = np.repeat(b, OH * OW)
    return M, bias


def prepare_params(params, depth, latent_dim):
    """One-time lowering (outside the jitted forward) into:
       - one bf16 [*, 256] weight slab (rows of each matrix padded to 16),
       - one f32 [8, 256] bias slab (one row per layer),
       plus the static row offsets used to slice the slab inside the kernel."""
    L = latent_dim
    assert 2 * L <= 256

    m1, b1 = _lower_conv2d(params["conv1_w"], params["conv1_b"], (depth, 4, 4), 1, 1)
    m2, b2 = _lower_conv2d(params["conv2_w"], params["conv2_b"], (16, 4, 4), 2, 0)
    m_ct, b_ct = _lower_conv_transpose2d(params["convt_w"], params["convt_b"], (32, 2, 2), 2)
    m3, b3 = _lower_conv2d(params["conv3_w"], params["conv3_b"], (16, 4, 4), 1, 1)

    # fc_mu / fc_logvar fused side by side.
    w_ml = np.concatenate([np.asarray(params["fc_mu_w"], np.float32).T,
                           np.asarray(params["fc_lv_w"], np.float32).T], axis=1)  # [128, 2L]
    b_ml = np.concatenate([np.asarray(params["fc_mu_b"], np.float32),
                           np.asarray(params["fc_lv_b"], np.float32)])            # [2L]

    # Compose decoder_fc (no activation -> exact) into the conv-transpose matrix.
    w_dec_T = np.asarray(params["dec_fc_w"], np.float32).T                        # [L, 128]
    b_dec = np.asarray(params["dec_fc_b"], np.float32)                            # [128]
    m_dec_ct = w_dec_T @ m_ct                                                     # [L, 256]
    b_dec_ct = b_dec @ m_ct + b_ct                                                # [256]

    mats = [m1, m2, w_ml, m_dec_ct, m3]
    biases = [b1, b2, b_ml, b_dec_ct, b3]

    blocks, offs, cur = [], [], 0
    for m in mats:
        r, c = m.shape
        assert c <= 256
        rp = -(-r // 16) * 16            # pad rows to the bf16 sublane tile (16)
        blk = np.zeros((rp, 256), np.float32)
        blk[:r, :c] = m
        blocks.append(blk)
        offs.append(cur)
        cur += rp
    offs.append(cur)                     # total rows
    w_packed = np.concatenate(blocks, axis=0)

    b_packed = np.zeros((8, 256), np.float32)
    for i, b in enumerate(biases):
        b_packed[i, :b.shape[0]] = b

    packed = {"w": jnp.asarray(w_packed, jnp.bfloat16),
              "b": jnp.asarray(b_packed, jnp.float32)}
    return packed, tuple(int(o) for o in offs)


# ----------------------------------------------------------------------------
# Pure-JAX f32 reference (PyTorch semantics) for validation.
# ----------------------------------------------------------------------------
def _ref_forward(params, x, eps):
    def conv(h, w, b, stride, pad):
        y = jax.lax.conv_general_dilated(
            h, w, window_strides=(stride, stride),
            padding=((pad, pad), (pad, pad)),
            dimension_numbers=("NCHW", "OIHW", "NCHW"))
        return y + b.reshape(1, -1, 1, 1)

    B = x.shape[0]
    h = jax.nn.relu(conv(x, params["conv1_w"], params["conv1_b"], 1, 1))
    h = jax.nn.relu(conv(h, params["conv2_w"], params["conv2_b"], 2, 0))
    h = h.reshape(B, -1)
    mu = h @ params["fc_mu_w"].T + params["fc_mu_b"]
    logvar = h @ params["fc_lv_w"].T + params["fc_lv_b"]
    z = eps * jnp.exp(0.5 * logvar) + mu
    hd = (z @ params["dec_fc_w"].T + params["dec_fc_b"]).reshape(B, 32, 2, 2)
    # ConvTranspose2d(32,16,k=2,s=2): kernel==stride, each input pixel fills a 2x2 block
    ht = jnp.einsum("bcij,cokl->boikjl", hd, params["convt_w"]).reshape(B, 16, 4, 4)
    ht = jax.nn.relu(ht + params["convt_b"].reshape(1, -1, 1, 1))
    rec = conv(ht, params["conv3_w"], params["conv3_b"], 1, 1)
    return rec, mu, logvar


# ----------------------------------------------------------------------------
if __name__ == "__main__":
    B, depth, latent_dim = 2, 4, 8
    k_x, k_eps, k_p = jax.random.split(jax.random.PRNGKey(0), 3)

    x = jax.random.normal(k_x, (B, depth, 4, 4), dtype=jnp.float32)
    eps = jax.random.normal(k_eps, (B, latent_dim), dtype=jnp.float32)

    params = init_params(k_p, depth, latent_dim)
    packed, row_offs = prepare_params(params, depth, latent_dim)

    fwd = jax.jit(functools.partial(vae_forward, latent_dim=latent_dim,
                                    row_offs=row_offs))
    x_recon, (mu, logvar) = fwd(packed, x, eps)
    jax.block_until_ready((x_recon, mu, logvar))

    assert x_recon.shape == (B, 1, 4, 4)
    assert mu.shape == (B, latent_dim)
    assert logvar.shape == (B, latent_dim)
    assert bool(jnp.all(jnp.isfinite(x_recon)))

    # Validate against a pure-JAX f32 reference (bf16 weights -> loose tolerance).
    ref_rec, ref_mu, ref_lv = _ref_forward(params, x, eps)
    np.testing.assert_allclose(np.asarray(x_recon), np.asarray(ref_rec),
                               rtol=5e-2, atol=5e-2)
    np.testing.assert_allclose(np.asarray(mu), np.asarray(ref_mu),
                               rtol=5e-2, atol=5e-2)
    np.testing.assert_allclose(np.asarray(logvar), np.asarray(ref_lv),
                               rtol=5e-2, atol=5e-2)

    print("KERNEL_OK")
</pallas_src>

<mosaic_0001>
module attributes {stable_mosaic.version = 11 : i64} {
  func.func @_vae_fused_kernel(%arg0: memref<8x64xf32, #tpu.memory_space<vmem>>, %arg1: memref<8x8xf32, #tpu.memory_space<vmem>>, %arg2: memref<720x256xbf16, #tpu.memory_space<vmem>>, %arg3: memref<8x256xf32, #tpu.memory_space<vmem>>, %arg4: memref<8x32xf32, #tpu.memory_space<vmem>>) attributes {dimension_semantics = [], scalar_prefetch = 0 : i64, scratch_operands = 0 : i64, tpu.core_type = #tpu.core_type<tc>} {
    %c0 = arith.constant 0 : index
    %c0_0 = arith.constant 0 : index
    %0 = vector.load %arg0[%c0, %c0_0] : memref<8x64xf32, #tpu.memory_space<vmem>>, vector<8x64xf32>
    %1 = arith.truncf %0 : vector<8x64xf32> to vector<8x64xbf16>
    %c0_1 = arith.constant 0 : index
    %c0_2 = arith.constant 0 : index
    %2 = vector.load %arg2[%c0_1, %c0_2] : memref<720x256xbf16, #tpu.memory_space<vmem>>, vector<64x256xbf16>
    %cst = arith.constant dense<0.000000e+00> : vector<8x256xf32>
    %3 = tpu.matmul %1, %2, %cst {dimension_numbers = #tpu.dot_dimension_numbers<[1], [0], [0], [1], [0, 0, 1, 1], [], []>} : vector<8x64xbf16>, vector<64x256xbf16>, vector<8x256xf32> -> vector<8x256xf32>
    %c0_3 = arith.constant 0 : index
    %c0_4 = arith.constant 0 : index
    %4 = vector.load %arg3[%c0_3, %c0_4] : memref<8x256xf32, #tpu.memory_space<vmem>>, vector<1x256xf32>
    %5 = vector.broadcast %4 : vector<1x256xf32> to vector<8x256xf32>
    %6 = arith.addf %3, %5 : vector<8x256xf32>
    %cst_5 = arith.constant 0.000000e+00 : f32
    %7 = vector.broadcast %cst_5 : f32 to vector<8x256xf32>
    %8 = arith.maximumf %6, %7 : vector<8x256xf32>
    %9 = arith.truncf %8 : vector<8x256xf32> to vector<8x256xbf16>
    %c64 = arith.constant 64 : index
    %c0_6 = arith.constant 0 : index
    %10 = vector.load %arg2[%c64, %c0_6] : memref<720x256xbf16, #tpu.memory_space<vmem>>, vector<256x128xbf16>
    %cst_7 = arith.constant dense<0.000000e+00> : vector<8x128xf32>
    %11 = tpu.matmul %9, %10, %cst_7 {dimension_numbers = #tpu.dot_dimension_numbers<[1], [0], [0], [1], [0, 0, 1, 1], [], []>} : vector<8x256xbf16>, vector<256x128xbf16>, vector<8x128xf32> -> vector<8x128xf32>
    %c1 = arith.constant 1 : index
    %c0_8 = arith.constant 0 : index
    %12 = vector.load %arg3[%c1, %c0_8] : memref<8x256xf32, #tpu.memory_space<vmem>>, vector<1x128xf32>
    %13 = vector.broadcast %12 : vector<1x128xf32> to vector<8x128xf32>
    %14 = arith.addf %11, %13 : vector<8x128xf32>
    %cst_9 = arith.constant 0.000000e+00 : f32
    %15 = vector.broadcast %cst_9 : f32 to vector<8x128xf32>
    %16 = arith.maximumf %14, %15 : vector<8x128xf32>
    %17 = arith.truncf %16 : vector<8x128xf32> to vector<8x128xbf16>
    %c320 = arith.constant 320 : index
    %c0_10 = arith.constant 0 : index
    %18 = vector.load %arg2[%c320, %c0_10] : memref<720x256xbf16, #tpu.memory_space<vmem>>, vector<128x16xbf16>
    %cst_11 = arith.constant dense<0.000000e+00> : vector<8x16xf32>
    %19 = tpu.matmul %17, %18, %cst_11 {dimension_numbers = #tpu.dot_dimension_numbers<[1], [0], [0], [1], [0, 0, 1, 1], [], []>} : vector<8x128xbf16>, vector<128x16xbf16>, vector<8x16xf32> -> vector<8x16xf32>
    %c2 = arith.constant 2 : index
    %c0_12 = arith.constant 0 : index
    %20 = vector.load %arg3[%c2, %c0_12] : memref<8x256xf32, #tpu.memory_space<vmem>>, vector<1x16xf32>
    %21 = vector.broadcast %20 : vector<1x16xf32> to vector<8x16xf32>
    %22 = arith.addf %19, %21 : vector<8x16xf32>
    %23 = vector.extract_strided_slice %22 {offsets = [0, 0], sizes = [8, 8], strides = [1, 1]} : vector<8x16xf32> to vector<8x8xf32>
    %24 = vector.extract_strided_slice %22 {offsets = [0, 8], sizes = [8, 8], strides = [1, 1]} : vector<8x16xf32> to vector<8x8xf32>
    %c0_13 = arith.constant 0 : index
    %c0_14 = arith.constant 0 : index
    %25 = vector.load %arg1[%c0_13, %c0_14] : memref<8x8xf32, #tpu.memory_space<vmem>>, vector<8x8xf32>
    %cst_15 = arith.constant 5.000000e-01 : f32
    %26 = vector.broadcast %cst_15 : f32 to vector<8x8xf32>
    %27 = arith.mulf %24, %26 : vector<8x8xf32>
    %28 = math.exp %27 : vector<8x8xf32>
    %29 = arith.mulf %25, %28 : vector<8x8xf32>
    %30 = arith.addf %29, %23 : vector<8x8xf32>
    %31 = arith.truncf %30 : vector<8x8xf32> to vector<8x8xbf16>
    %c448 = arith.constant 448 : index
    %c0_16 = arith.constant 0 : index
    %32 = vector.load %arg2[%c448, %c0_16] : memref<720x256xbf16, #tpu.memory_space<vmem>>, vector<8x256xbf16>
    %cst_17 = arith.constant dense<0.000000e+00> : vector<8x256xf32>
    %33 = tpu.matmul %31, %32, %cst_17 {dimension_numbers = #tpu.dot_dimension_numbers<[1], [0], [0], [1], [0, 0, 1, 1], [], []>} : vector<8x8xbf16>, vector<8x256xbf16>, vector<8x256xf32> -> vector<8x256xf32>
    %c3 = arith.constant 3 : index
    %c0_18 = arith.constant 0 : index
    %34 = vector.load %arg3[%c3, %c0_18] : memref<8x256xf32, #tpu.memory_space<vmem>>, vector<1x256xf32>
    %35 = vector.broadcast %34 : vector<1x256xf32> to vector<8x256xf32>
    %36 = arith.addf %33, %35 : vector<8x256xf32>
    %cst_19 = arith.constant 0.000000e+00 : f32
    %37 = vector.broadcast %cst_19 : f32 to vector<8x256xf32>
    %38 = arith.maximumf %36, %37 : vector<8x256xf32>
    %39 = arith.truncf %38 : vector<8x256xf32> to vector<8x256xbf16>
    %c464 = arith.constant 464 : index
    %c0_20 = arith.constant 0 : index
    %40 = vector.load %arg2[%c464, %c0_20] : memref<720x256xbf16, #tpu.memory_space<vmem>>, vector<256x16xbf16>
    %cst_21 = arith.constant dense<0.000000e+00> : vector<8x16xf32>
    %41 = tpu.matmul %39, %40, %cst_21 {dimension_numbers = #tpu.dot_dimension_numbers<[1], [0], [0], [1], [0, 0, 1, 1], [], []>} : vector<8x256xbf16>, vector<256x16xbf16>, vector<8x16xf32> -> vector<8x16xf32>
    %c4 = arith.constant 4 : index
    %c0_22 = arith.constant 0 : index
    %42 = vector.load %arg3[%c4, %c0_22] : memref<8x256xf32, #tpu.memory_space<vmem>>, vector<1x16xf32>
    %43 = vector.broadcast %42 : vector<1x16xf32> to vector<8x16xf32>
    %44 = arith.addf %41, %43 : vector<8x16xf32>
    %45 = tpu.concatenate %44, %22 in 1 : vector<8x16xf32>, vector<8x16xf32> -> vector<8x32xf32>
    %c0_23 = arith.constant 0 : index
    %c0_24 = arith.constant 0 : index
    %46 = vector.load %arg4[%c0_23, %c0_24] : memref<8x32xf32, #tpu.memory_space<vmem>>, vector<8x32xf32>
    tpu.vector_store %arg4[%c0_23, %c0_24], %45 {strides = array<i32>} : memref<8x32xf32, #tpu.memory_space<vmem>>, vector<8x32xf32>,
    return
  }
}

</mosaic_0001>

<bundles_post_ra>
// kernel: vae_forward.1
= control target key start
LH: loop header
LB: loop body
LE: loop exit
PB: predicated region body
PF: predicated region fallthrough
CT: control target
= control target key end

     0   :  { %9 = vsyncpa [#allocation3], 0  ;;  %s870_s18 = smov [#allocation2]   ;;  %s871_s20 = smov 128   ;;  %s927_s0 = inlined_call_operand.vmem [shape: f32[8,64], index: 0, kind: input, shape index: {}]   ;;  %s928_s1 = inlined_call_operand.vmem [shape: f32[8,8], index: 1, kind: input, shape index: {}]   ;;  %s929_s2 = inlined_call_operand.hbm [shape: bf16[720,256], index: 2, kind: input, shape index: {}]   ;;  %s930_s3 = inlined_call_operand.vmem [shape: f32[8,256], index: 3, kind: input, shape index: {}]   ;;  %s931_s4 = inlined_call_operand.vmem [shape: f32[8,32], index: 4, kind: output, shape index: {}]  }
   0x1   :  { %s18_s17 = sshll.u32 %s929_s2, 4  ;;  %s20_s19 = sshll.u32 %s870_s18, 4  ;;  %s19_s17 = int_to_ptr.hbm [resolvable:$true] %s18_s17  ;;  %s21_s19 = int_to_ptr.vmem [resolvable:$true] %s20_s19 }
   0x2   :  { %s872_s21 = smov 8  }
   0x3   :  { %26 = dma.hbm_to_vmem [thread:$0]  %s19_s17, 11520, %s21_s19, [#allocation3], %s871_s20, %s871_s20, %s872_s21  }
   0x4   :  { %868 = dma.done.wait [#allocation3], 11520  }
   0x5   :  { %869 = vsyncadd [#allocation3], 4294955776  ;;  %v618_v0 = vld [vmem:[#allocation2 + $0x30] sm:$0xf]  ;;  %v796_v1 = vld [vmem:[#allocation2 + $0x34] sm:$0xf0] }
   0x6   :  { %v795_v2 = vld [vmem:[#allocation2 + $0x34] sm:$0xf]  ;;  %v619_v3 = vor.u32 %v796_v1, %v618_v0  ;;  %v620_v4 = vld [vmem:[#allocation2 + $0x38] sm:$0xf0]  ;;  %v610_v5 = vld [vmem:[#allocation2 + $0x20] sm:$0xf] }
   0x7   :  { %v794_v6 = vld [vmem:[#allocation2 + $0x24] sm:$0xf0]  ;;  %v623_v7 = vor.u32 %v795_v2, %v620_v4  ;;  %v793_v8 = vld [vmem:[#allocation2 + $0x24] sm:$0xf]  ;;  %v612_v9 = vld [vmem:[#allocation2 + $0x28] sm:$0xf0] }
   0x8   :  { %98 = vmatpush.bf16.msra.mxu0 %v619_v3  ;;  %v611_v10 = vor.u32 %v794_v6, %v610_v5  ;;  %v615_v11 = vor.u32 %v793_v8, %v612_v9  ;;  %v602_v12 = vld [vmem:[#allocation2 + $0x10] sm:$0xf]  ;;  %v792_v13 = vld [vmem:[#allocation2 + $0x14] sm:$0xf0]  ;;  %v791_v14 = vld [vmem:[#allocation2 + $0x14] sm:$0xf] }
   0x9   :  { %111 = vmatpush.bf16.msra.mxu1 %v623_v7  ;;  %v604_v15 = vld [vmem:[#allocation2 + $0x18] sm:$0xf0]  ;;  %v656_v16 = vld [vmem:[#allocation2 + $0xb0] sm:$0xf]  ;;  %v804_v17 = vld [vmem:[#allocation2 + $0xb4] sm:$0xf0]  ;;  %v603_v20 = vor.u32 %v792_v13, %v602_v12 }
   0xa   :  { %v688_v18 = vld [vmem:[#allocation2 + $0x130] sm:$0xf]  ;;  %v812_v19 = vld [vmem:[#allocation2 + $0x134] sm:$0xf0]  ;;  %v657_v21 = vor.u32 %v804_v17, %v656_v16  ;;  %v652_v23 = vld [vmem:[#allocation2 + $0xa0] sm:$0xf]  ;;  %v607_v26 = vor.u32 %v791_v14, %v604_v15 }
   0xb   :  { %v689_v22 = vor.u32 %v812_v19, %v688_v18  ;;  %v803_v24 = vld [vmem:[#allocation2 + $0xa4] sm:$0xf0]  ;;  %v684_v25 = vld [vmem:[#allocation2 + $0x120] sm:$0xf]  ;;  %v789_v30 = vld [vmem:[#allocation2 + $0x4] sm:$0xf] }
   0xc   :  { %99 = vmatpush.bf16.msra.mxu0 %v611_v10  ;;  %v594_v27 = vld [vmem:[#allocation2] sm:$0xf]  ;;  %v790_v28 = vld [vmem:[#allocation2 + $0x4] sm:$0xf0]  ;;  %v596_v31 = vld [vmem:[#allocation2 + $0x8] sm:$0xf0]  ;;  %253 = vmatpush.bf16.msra.mxu2 %v657_v21  ;;  %v653_v32 = vor.u32 %v803_v24, %v652_v23 }
   0xd   :  { %112 = vmatpush.bf16.msra.mxu1 %v615_v11  ;;  %v811_v29 = vld [vmem:[#allocation2 + $0x124] sm:$0xf0]  ;;  %266 = vmatpush.bf16.msra.mxu3 %v689_v22  ;;  %v648_v34 = vld [vmem:[#allocation2 + $0x90] sm:$0xf]  ;;  %v802_v35 = vld [vmem:[#allocation2 + $0x94] sm:$0xf0]  ;;  %v595_v38 = vor.u32 %v790_v28, %v594_v27  ;;  %v599_v40 = vor.u32 %v789_v30, %v596_v31 }
   0xe   :  { %v685_v33 = vor.u32 %v811_v29, %v684_v25  ;;  %v680_v36 = vld [vmem:[#allocation2 + $0x110] sm:$0xf]  ;;  %v810_v37 = vld [vmem:[#allocation2 + $0x114] sm:$0xf0]  ;;  %v34_v39 = vld [vmem:[%s927_s0] sm:$0xff]  ;;  %v649_v41 = vor.u32 %v802_v35, %v648_v34  ;;  %vm90_vm0 = vcmask 523264  }
   0xf   :  { %v681_v42 = vor.u32 %v810_v37, %v680_v36  ;;  %v644_v43 = vld [vmem:[#allocation2 + $0x80] sm:$0xf]  ;;  %v35_v44 = vpack.c.bf16 %v34_v39, %v34_v39  ;;  %v801_v45 = vld [vmem:[#allocation2 + $0x84] sm:$0xf0]  ;;  %v640_v50 = vld [vmem:[#allocation2 + $0x70] sm:$0xf] }
  0x10   :  { %100 = vmatpush.bf16.msra.mxu0 %v603_v20  ;;  %254 = vmatpush.bf16.msra.mxu2 %v653_v32  ;;  %v676_v46 = vld [vmem:[#allocation2 + $0x100] sm:$0xf]  ;;  %v809_v47 = vld [vmem:[#allocation2 + $0x104] sm:$0xf0]  ;;  %v645_v48 = vor.u32 %v801_v45, %v644_v43  ;;  %v800_v51 = vld [vmem:[#allocation2 + $0x74] sm:$0xf0] }
  0x11   :  { %113 = vmatpush.bf16.msra.mxu1 %v607_v26  ;;  %267 = vmatpush.bf16.msra.mxu3 %v685_v33  ;;  %v677_v49 = vor.u32 %v809_v47, %v676_v46  ;;  %v672_v52 = vld [vmem:[#allocation2 + $0xf0] sm:$0xf]  ;;  %v808_v53 = vld [vmem:[#allocation2 + $0xf4] sm:$0xf0]  ;;  %v641_v54 = vor.u32 %v800_v51, %v640_v50  ;;  %v636_v56 = vld [vmem:[#allocation2 + $0x60] sm:$0xf] }
  0x12   :  { %v673_v55 = vor.u32 %v808_v53, %v672_v52  ;;  %v799_v57 = vld [vmem:[#allocation2 + $0x64] sm:$0xf0]  ;;  %v668_v58 = vld [vmem:[#allocation2 + $0xe0] sm:$0xf]  ;;  %v632_v62 = vld [vmem:[#allocation2 + $0x50] sm:$0xf] }
  0x13   :  { %v807_v59 = vld [vmem:[#allocation2 + $0xe4] sm:$0xf0]  ;;  %v637_v60 = vor.u32 %v799_v57, %v636_v56  ;;  %v798_v63 = vld [vmem:[#allocation2 + $0x54] sm:$0xf0]  ;;  %v664_v0 = vld [vmem:[#allocation2 + $0xd0] sm:$0xf] }
  0x14   :  { %101 = vmatpush.bf16.msra.mxu0 %v595_v38  ;;  %255 = vmatpush.bf16.msra.mxu2 %v649_v41  ;;  %v669_v61 = vor.u32 %v807_v59, %v668_v58  ;;  %v633_v1 = vor.u32 %v798_v63, %v632_v62  ;;  %v806_v2 = vld [vmem:[#allocation2 + $0xd4] sm:$0xf0]  ;;  %v628_v4 = vld [vmem:[#allocation2 + $0x40] sm:$0xf]  ;;  %v797_v5 = vld [vmem:[#allocation2 + $0x44] sm:$0xf0] }
  0x15   :  { %114 = vmatpush.bf16.msra.mxu1 %v599_v40  ;;  %268 = vmatpush.bf16.msra.mxu3 %v681_v42  ;;  %v665_v3 = vor.u32 %v806_v2, %v664_v0  ;;  %v660_v6 = vld [vmem:[#allocation2 + $0xc0] sm:$0xf]  ;;  %v629_v7 = vor.u32 %v797_v5, %v628_v4  ;;  %v805_v8 = vld [vmem:[#allocation2 + $0xc4] sm:$0xf0]  ;;  %v720_v10 = vld [vmem:[#allocation2 + $0x1b0] sm:$0xf] }
  0x16   :  { %v661_v9 = vor.u32 %v805_v8, %v660_v6  ;;  %v820_v11 = vld [vmem:[#allocation2 + $0x1b4] sm:$0xf0]  ;;  %v716_v12 = vld [vmem:[#allocation2 + $0x1a0] sm:$0xf]  ;;  %v819_v14 = vld [vmem:[#allocation2 + $0x1a4] sm:$0xf0] }
  0x17   :  { %624 = vmatmul.msk.bf16.vlgmr.msra.gmra.mxu0 %vm90_vm0, %v35_v44  ;;  %v721_v13 = vor.u32 %v820_v11, %v720_v10  ;;  %v717_v15 = vor.u32 %v819_v14, %v716_v12  ;;  %v712_v16 = vld [vmem:[#allocation2 + $0x190] sm:$0xf]  ;;  %v818_v17 = vld [vmem:[#allocation2 + $0x194] sm:$0xf0]  ;;  %v708_v19 = vld [vmem:[#allocation2 + $0x180] sm:$0xf] }
  0x18   :  { %625 = vmatmul.msk.bf16.vlgmr.msra.gmra.mxu1 %vm90_vm0, %v35_v44  ;;  %256 = vmatpush.bf16.msra.mxu2 %v645_v48  ;;  %v713_v18 = vor.u32 %v818_v17, %v712_v16  ;;  %v817_v20 = vld [vmem:[#allocation2 + $0x184] sm:$0xf0]  ;;  %v704_v22 = vld [vmem:[#allocation2 + $0x170] sm:$0xf]  ;;  %v816_v23 = vld [vmem:[#allocation2 + $0x174] sm:$0xf0] }
  0x19   :  { %269 = vmatpush.bf16.msra.mxu3 %v677_v49  ;;  %346 = vmatpush.bf16.msrb.mxu0 %v721_v13  ;;  %v709_v21 = vor.u32 %v817_v20, %v708_v19  ;;  %v705_v24 = vor.u32 %v816_v23, %v704_v22  ;;  %v700_v25 = vld [vmem:[#allocation2 + $0x160] sm:$0xf]  ;;  %v815_v26 = vld [vmem:[#allocation2 + $0x164] sm:$0xf0]  ;;  %v696_v41 = vld [vmem:[#allocation2 + $0x150] sm:$0xf] }
  0x1a   :  { %v44_v27 = vld [vmem:[%s930_s3] ss:$8 sm:$0x3]  ;;  %v701_v28 = vor.u32 %v815_v26, %v700_v25  ;;  %v814_v42 = vld [vmem:[#allocation2 + $0x154] sm:$0xf0]  ;;  %vm387_vm1 = vcmask 1043456  }
  0x1b   :  { %v46_v29 = vperm.slane %v44_v27, 0  ;;  %v47_v30 = vperm.slane %v44_v27, 1  ;;  %v697_v43 = vor.u32 %v814_v42, %v696_v41  ;;  %v692_v44 = vld [vmem:[#allocation2 + $0x140] sm:$0xf]  ;;  %v813_v45 = vld [vmem:[#allocation2 + $0x144] sm:$0xf0] }
  0x1c   :  { %257 = vmatpush.bf16.msra.mxu2 %v641_v54  ;;  %v693_v46 = vor.u32 %v813_v45, %v692_v44  ;;  %v156_v47 = vld [vmem:[%s930_s3 + $0x1] ss:$0 sm:$0xff]  ;;  %v297_v63 = vld [vmem:[%s930_s3 + $0x2] ss:$0 sm:$0xff]  ;;  %s873_s28 = smov 120   ;;  %s874_s29 = smov 16  }
  0x1d   :  { %270 = vmatpush.bf16.msra.mxu3 %v673_v55  ;;  %347 = vmatpush.bf16.msrb.mxu0 %v717_v15  ;;  %v370_v56 = vld [vmem:[#allocation2 + $0x1c0] sm:$0xff]  ;;  %v751_v8 = vld [vmem:[#allocation2 + $0x230] sm:$0xf]  ;;  %v827_v10 = vld [vmem:[#allocation2 + $0x234] sm:$0xf0]  ;;  %vm383_vm2 = vcmask 64512  }
  0x1e   :  { %v379_v57 = vunpack.c.l.b16 %v370_v56  ;;  %v380_v58 = vunpack.c.h.b16 %v370_v56  ;;  %v755_v6 = vld [vmem:[#allocation2 + $0x240] sm:$0xf]  ;;  %v752_v11 = vor.u32 %v827_v10, %v751_v8  ;;  %v836_v13 = vld [vmem:[#allocation2 + $0x2c4] sm:$0xf0]  ;;  %v783_v17 = vld [vmem:[#allocation2 + $0x2b0] sm:$0xf] }
  0x1f   :  { %v787_v12 = vld [vmem:[#allocation2 + $0x2c0] sm:$0xf]  ;;  %v826_v15 = vld [vmem:[#allocation2 + $0x224] sm:$0xf0]  ;;  %v743_v22 = vld [vmem:[#allocation2 + $0x210] sm:$0xf] }
  0x20   :  { %258 = vmatpush.bf16.msra.mxu2 %v637_v60  ;;  %v381_v59 = vpack.c.b16 %v379_v57, %v379_v57  ;;  %v382_v60 = vpack.c.b16 %v380_v58, %v380_v58  ;;  %v747_v14 = vld [vmem:[#allocation2 + $0x220] sm:$0xf]  ;;  %v788_v16 = vor.u32 %v836_v13, %v787_v12  ;;  %v825_v23 = vld [vmem:[#allocation2 + $0x214] sm:$0xf0]  ;;  %v727_v41 = vld [vmem:[#allocation2 + $0x1d0] sm:$0xf] }
  0x21   :  { %271 = vmatpush.bf16.msra.mxu3 %v669_v61  ;;  %348 = vmatpush.bf16.msrb.mxu0 %v713_v18  ;;  %v835_v18 = vld [vmem:[#allocation2 + $0x2b4] sm:$0xf0]  ;;  %v359_v20 = vld [vmem:[%s928_s1] sm:$0xff]  ;;  %v744_v26 = vor.u32 %v825_v23, %v743_v22  ;;  %v759_v56 = vld [vmem:[#allocation2 + $0x250] sm:$0xf]  ;;  %vm583_vm3 = vcmask 130048  }
  0x22   :  { %v389_v61 = vsel %vm387_vm1, %v381_v59, 0  ;;  %v392_v62 = vsel %vm387_vm1, %v382_v60, 0  ;;  %v784_v19 = vor.u32 %v835_v18, %v783_v17  ;;  %v821_v42 = vld [vmem:[#allocation2 + $0x1d4] sm:$0xf0]  ;;  %v456_v10 = vld [vmem:[%s930_s3 + $0x4] ss:$0 sm:$0xff] }
  0x23   :  { %401 = vmatpush.bf16.msrb.mxu1 %v389_v61  ;;  %v728_v44 = vor.u32 %v821_v42, %v727_v41  ;;  %v833_v45 = vld [vmem:[#allocation2 + $0x294] sm:$0xf0]  ;;  %v722_v59 = vld [vmem:[%s930_s3 + $0x3] ss:$8 sm:$0x3]  ;;  %vm585_vm4 = vcmask 261120  }
  0x24   :  { %259 = vmatpush.bf16.msra.mxu2 %v633_v1  ;;  %v829_v57 = vld [vmem:[#allocation2 + $0x254] sm:$0xf0]  ;;  %v374_v60 = vperm.slane %v722_v59, 0 }
  0x25   :  { %272 = vmatpush.bf16.msra.mxu3 %v665_v3  ;;  %349 = vmatpush.bf16.msrb.mxu0 %v709_v21  ;;  %v748_v21 = vor.u32 %v826_v15, %v747_v14  ;;  %v760_v58 = vor.u32 %v829_v57, %v759_v56 }
  0x27   :  { %414 = vmatpush.bf16.msra.mxu1 %v392_v62 }
  0x28   :  { %260 = vmatpush.bf16.msra.mxu2 %v629_v7  ;;  %v828_v7 = vld [vmem:[#allocation2 + $0x244] sm:$0xf0] }
  0x29   :  { %273 = vmatpush.bf16.msra.mxu3 %v661_v9  ;;  %350 = vmatpush.bf16.msrb.mxu0 %v705_v24  ;;  %v756_v9 = vor.u32 %v828_v7, %v755_v6 }
  0x2c   :  { %553 = vmatpush.bf16.msrb.mxu2 %v756_v9 }
  0x2d   :  { %351 = vmatpush.bf16.msrb.mxu0 %v701_v28  ;;  %566 = vmatpush.bf16.msrb.mxu3 %v788_v16  ;;  %v739_v28 = vld [vmem:[#allocation2 + $0x200] sm:$0xf] }
  0x30   :  { %554 = vmatpush.bf16.msrb.mxu2 %v752_v11 }
  0x31   :  { %352 = vmatpush.bf16.msrb.mxu0 %v697_v43  ;;  %567 = vmatpush.bf16.msrb.mxu3 %v784_v19  ;;  %v775_v43 = vld [vmem:[#allocation2 + $0x290] sm:$0xf] }
  0x34   :  { %555 = vmatpush.bf16.msrb.mxu2 %v748_v21 }
  0x35   :  { %353 = vmatpush.bf16.msrb.mxu0 %v693_v46  ;;  %v776_v46 = vor.u32 %v833_v45, %v775_v43 }
  0x38   :  { %556 = vmatpush.bf16.msrb.mxu2 %v744_v26 }
  0x94   :  { %v103_v31 = vpop.f32.mrf.mxu0 }
  0x95   :  { %v104_v32 = vadd.f32 %v103_v31, %v46_v29  ;;  %v116_v33 = vpop.f32.mrf.mxu1  ;;  %v824_v29 = vld [vmem:[#allocation2 + $0x204] sm:$0xf0] }
  0x96   :  { %v117_v34 = vadd.f32 %v116_v33, %v47_v30  ;;  %v740_v31 = vor.u32 %v824_v29, %v739_v28  ;;  %v823_v33 = vld [vmem:[#allocation2 + $0x1f4] sm:$0xf0] }
  0x97   :  { %v120_v35 = vmax.f32 %v104_v32, 0.0  ;;  %v735_v32 = vld [vmem:[#allocation2 + $0x1f0] sm:$0xf] }
  0x98   :  { %v121_v36 = vmax.f32 %v117_v34, 0.0  ;;  %557 = vmatpush.bf16.msrb.mxu2 %v740_v31  ;;  %v736_v34 = vor.u32 %v823_v33, %v735_v32 }
  0x99   :  { %v122_v37 = vpack.c.bf16 %v120_v35, %v120_v35  ;;  %v731_v35 = vld [vmem:[#allocation2 + $0x1e0] sm:$0xf] }
  0x9a   :  { %v123_v38 = vpack.c.bf16 %v121_v36, %v121_v36  ;;  %v822_v36 = vld [vmem:[#allocation2 + $0x1e4] sm:$0xf0] }
  0x9b   :  { %261 = vmatmul.bf16.vlgmr.msra.gmra.mxu2 %v122_v37  ;;  %v779_v37 = vld [vmem:[#allocation2 + $0x2a0] sm:$0xf] }
  0x9c   :  { %274 = vmatmul.bf16.vlgmr.msra.gmra.mxu3 %v123_v38  ;;  %v105_v39 = vpop.f32.mrf.mxu0  ;;  %558 = vmatpush.bf16.msrb.mxu2 %v736_v34  ;;  %v732_v38 = vor.u32 %v822_v36, %v731_v35 }
  0x9d   :  { %v118_v40 = vpop.f32.mrf.mxu1  ;;  %v834_v39 = vld [vmem:[#allocation2 + $0x2a4] sm:$0xf0] }
  0x9e   :  { %v780_v40 = vor.u32 %v834_v39, %v779_v37 }
  0xa0   :  { %559 = vmatpush.bf16.msrb.mxu2 %v732_v38  ;;  %568 = vmatpush.bf16.msrb.mxu3 %v780_v40 }
  0xa4   :  { %560 = vmatpush.bf16.msrb.mxu2 %v728_v44  ;;  %569 = vmatpush.bf16.msrb.mxu3 %v776_v46 }
 0x11e   :  { %v262_v48 = vpop.f32.mrf.mxu2 }
 0x11f   :  { %v263_v49 = vadd.f32 %v262_v48, %v156_v47  ;;  %v275_v50 = vpop.f32.mrf.mxu3  ;;  %v771_v47 = vld [vmem:[#allocation2 + $0x280] sm:$0xf]  ;;  %v832_v48 = vld [vmem:[#allocation2 + $0x284] sm:$0xf0] }
 0x121   :  { %v276_v51 = vadd.f32 %v275_v50, %v263_v49  ;;  %v772_v49 = vor.u32 %v832_v48, %v771_v47  ;;  %v767_v50 = vld [vmem:[#allocation2 + $0x270] sm:$0xf] }
 0x123   :  { %v279_v52 = vmax.f32 %v276_v51, 0.0  ;;  %v831_v51 = vld [vmem:[#allocation2 + $0x274] sm:$0xf0]  ;;  %570 = vmatpush.bf16.msrb.mxu3 %v772_v49 }
 0x125   :  { %v280_v53 = vpack.c.bf16 %v279_v52, %v279_v52  ;;  %v768_v52 = vor.u32 %v831_v51, %v767_v50 }
 0x126   :  { %v264_v54 = vpop.f32.mrf.mxu2 }
 0x127   :  { %v277_v55 = vpop.f32.mrf.mxu3  ;;  %354 = vmatmul.bf16.vlgmr.msrb.gmra.mxu0 %v280_v53  ;;  %571 = vmatpush.bf16.msrb.mxu3 %v768_v52  ;;  %v763_v53 = vld [vmem:[#allocation2 + $0x260] sm:$0xf]  ;;  %v830_v54 = vld [vmem:[#allocation2 + $0x264] sm:$0xf0] }
 0x128   :  { %v764_v55 = vor.u32 %v830_v54, %v763_v53 }
 0x12b   :  { %572 = vmatpush.bf16.msrb.mxu3 %v764_v55 }
 0x12f   :  { %573 = vmatpush.bf16.msrb.mxu3 %v760_v58 }
 0x1a4   :  { %v355_v0 = vpop.f32.mrf.mxu0 }
 0x1a5   :  { %v356_v1 = vadd.f32 %v355_v0, %v297_v63 }
 0x1a7   :  { %v360_v2 = vmul.f32 0.5, %v356_v1 }
 0x1a9   :  { %v361_v3 = vmul.f32 1.442695, %v360_v2  ;;  %v375_v2 = vperm.slane %v722_v59, 1 }
 0x1ab   :  { %842 = vpow2.f32 %v361_v3 }
 0x1ac   :  { %v357_v4 = vpop.f32.mrf.mxu0 }
 0x1b1   :  { %v843_v5 = vpop.eup %842 }
 0x1b2   :  { %364 = vrot.lane.b32.xlu0 %v843_v5, %s873_s28 }
 0x1ba   :  { %580 = vrot.lane.b32.xlu0 %v356_v1, %s874_s29 }
 0x224   :  { %v365_v24 = vpop.permute.xlu0 %364 }
 0x225   :  { %v367_v25 = vmul.f32 %v365_v24, %v359_v20 }
 0x227   :  { %v368_v27 = vadd.f32 %v367_v25, %v356_v1 }
 0x229   :  { %v369_v30 = vpack.c.bf16 %v368_v27, %v368_v27 }
 0x22b   :  { %723 = vmatmul.msk.bf16.vlgmr.msrb.gmra.mxu1 %vm383_vm2, %v369_v30 }
 0x22c   :  { %v581_v14 = vpop.permute.xlu0 %580 }
 0x23b   :  { %724 = vmatmul.msk.bf16.vlgmr.msra.gmra.mxu1 %vm383_vm2, %v369_v30 }
 0x2a8   :  { %v403_v61 = vpop.f32.mrf.mxu1 }
 0x2a9   :  { %v404_v62 = vadd.f32 %v403_v61, %v374_v60 }
 0x2ab   :  { %v420_v63 = vmax.f32 %v404_v62, 0.0 }
 0x2ad   :  { %v422_v0 = vpack.c.bf16 %v420_v63, %v420_v63 }
 0x2af   :  { %561 = vmatmul.bf16.vlgmr.msrb.gmra.mxu2 %v422_v0 }
 0x2b0   :  { %v405_v1 = vpop.f32.mrf.mxu1 }
 0x2b8   :  { %v416_v3 = vpop.f32.mrf.mxu1 }
 0x2b9   :  { %v417_v4 = vadd.f32 %v416_v3, %v375_v2 }
 0x2bb   :  { %v421_v5 = vmax.f32 %v417_v4, 0.0 }
 0x2bd   :  { %v423_v6 = vpack.c.bf16 %v421_v5, %v421_v5 }
 0x2bf   :  { %574 = vmatmul.bf16.vlgmr.msrb.gmra.mxu3 %v423_v6 }
 0x2c0   :  { %v418_v7 = vpop.f32.mrf.mxu1 }
 0x332   :  { %v562_v8 = vpop.f32.mrf.mxu2 }
 0x333   :  { %v563_v11 = vadd.f32 %v562_v8, %v456_v10 }
 0x33a   :  { %v564_v9 = vpop.f32.mrf.mxu2 }
 0x342   :  { %v575_v12 = vpop.f32.mrf.mxu3 }
 0x343   :  { %v576_v13 = vadd.f32 %v575_v12, %v563_v11 }
 0x345   :  { %v584_v15 = vsel %vm583_vm3, %v576_v13, %v581_v14 }
 0x346   :  { %586 = vst.msk [vmem:[%s931_s4] sm:$0xff] %vm585_vm4, %v584_v15 }
 0x34a   :  { %v577_v16 = vpop.f32.mrf.mxu3 }
 0x34b   :  { %591 = vsyncpa [#allocation3], 1 }

</bundles_post_ra>
